<compile_context>
chip_gen: v5e
topology: v5e:2x2
jax: 0.10.0
libtpu: 0.0.40
codegen_flags: <defaults>
</compile_context>

<pallas_src>
import functools

import jax
import jax.numpy as jnp
from jax.experimental import pallas as pl
from jax.experimental.pallas import tpu as pltpu


# Conservative, generation-safe VMEM numbers: 24 MiB working-set budget for
# tile selection, 32 MiB requested scoped limit (v5e default is only 16 MiB;
# v7x physical VMEM is 64 MiB so 32 MiB leaves headroom everywhere).
_VMEM_BUDGET_BYTES = 24 * 1024 * 1024
_VMEM_LIMIT_BYTES = 32 * 1024 * 1024


def _tile_losses(labels_ref, logits_ref, weights_ref=None, *, ignore_label,
                 hw, tile, mask_tail, tile_idx):
    """Per-pixel CE for one lane tile. Classes on sublanes, pixels on lanes.

    Returns f32 (1, TILE) losses: 0.0 at ignore_label positions and at
    out-of-range lanes of a partial (ragged) last tile.
    """
    x = logits_ref[0].astype(jnp.float32)          # (C, TILE)
    y = labels_ref[0]                              # (1, TILE) int32
    c, t = x.shape

    # Numerically stable log-sum-exp over classes (sublane reduction -> XLU,
    # exp/log -> EUP slot).
    m = jnp.max(x, axis=0, keepdims=True)                               # (1, T)
    lse = m + jnp.log(jnp.sum(jnp.exp(x - m), axis=0, keepdims=True))   # (1, T)

    valid = y != ignore_label                      # (1, T) bool
    safe_y = jnp.where(valid, y, 0)                # (1, T)

    # Gather the target-class logit: a (C,1) class iota broadcast against the
    # (1,T) labels (no full (C,T) int32 iota materialized), then a
    # sublane-reduced select (no one-hot cast / vmul).
    cls = jax.lax.broadcasted_iota(jnp.int32, (c, 1), 0)                # (C, 1)
    picked = jnp.sum(jnp.where(cls == safe_y, x, 0.0),
                     axis=0, keepdims=True)                             # (1, T)

    if mask_tail:
        # Ragged last tile: mask lanes past the true pixel count HW.
        pix = tile_idx * tile + jax.lax.broadcasted_iota(jnp.int32, (1, t), 1)
        valid = jnp.logical_and(valid, pix < hw)

    val = lse - picked
    if weights_ref is not None:
        # Applied BEFORE the select below so garbage weights in out-of-range
        # tail lanes can never reach the accumulator (0 * NaN would be NaN).
        val = val * weights_ref[0].astype(jnp.float32)

    # NOTE: tail lanes of a partial block contain unspecified logits; exp/max
    # on that garbage may produce Inf/NaN.  They are dropped by this *select*
    # -- do NOT "optimize" it into multiply-by-mask arithmetic.
    return jnp.where(valid, val, 0.0)              # (1, T)


def _ce_sum_kernel(*refs, has_weights, inner_t, **kw):
    """Accumulates the (optionally weighted) loss sum over the pixel tiles of
    one (batch row, outer chunk) grid cell; writes one scalar per cell."""
    if has_weights:
        labels_ref, logits_ref, weights_ref, out_ref, acc_ref = refs
    else:
        labels_ref, logits_ref, out_ref, acc_ref = refs
        weights_ref = None

    it = pl.program_id(2)
    tile_idx = pl.program_id(1) * inner_t + it

    @pl.when(it == 0)
    def _():
        acc_ref[...] = jnp.zeros_like(acc_ref)

    acc_ref[...] += _tile_losses(labels_ref, logits_ref, weights_ref,
                                 tile_idx=tile_idx, **kw)

    @pl.when(it == pl.num_programs(2) - 1)
    def _():
        out_ref[...] = jnp.sum(acc_ref[...], axis=-1,
                               keepdims=True).reshape(1, 1, 1)


def _ce_pixel_kernel(labels_ref, logits_ref, out_ref, **kw):
    """Writes lane-dense per-pixel losses (1, 1, TILE) (top-k / weighted-topk path)."""
    out_ref[0] = _tile_losses(labels_ref, logits_ref, None,
                              tile_idx=pl.program_id(1), **kw)


def _pick_tile(hw, n_classes, *, has_fused_weights, per_pixel_out,
               max_tile_lanes=None):
    """Largest lane tile whose double-buffered working set fits the VMEM
    budget (C-aware), capped at the full HW row."""
    rows = n_classes + 1 + (1 if has_fused_weights else 0)  # logits+labels(+w)
    per_lane = 2 * 4 * rows          # double-buffered f32/int32 inputs
    per_lane += 4                    # f32 accumulator / loss row
    if per_pixel_out:
        per_lane += 2 * 4            # double-buffered (1,1,tile) f32 output
    cap = _VMEM_BUDGET_BYTES // per_lane
    if max_tile_lanes is not None:
        cap = min(cap, max_tile_lanes)
    if hw <= cap:
        return hw                    # full HW row: always a legal block shape
    return max(128, (cap // 128) * 128)


def deeplab_ce(logits_nchw, labels_nhw, *, ignore_label=-1,
               top_k_percent_pixels=1.0, weights=None, max_tile_lanes=None):
    """JAX/Pallas equivalent of DeepLabCE.forward (per-class weight=None).

    Notes:
      * For top_k_percent_pixels == 1.0 the mean denominator is ALL N*H*W
        pixels (ignored pixels contribute 0 but are still counted), exactly
        like the original module (reduction='none' then .mean()); this differs
        from CrossEntropyLoss(reduction='mean') semantics.
      * logits may be bf16; they are upcast to f32 in-register inside the
        kernel.
    """
    # TODO(synk): per-class `weight` tensor of nn.CrossEntropyLoss is not
    # implemented (the module default weight=None is what we translate).
    n, c, h, w = logits_nchw.shape
    hw = h * w
    p = n * hw

    # Contiguous NCHW -> (N, C, H*W) / NHW -> (N, 1, H*W) reshapes are
    # metadata-only: no transpose / pad HBM round trips.
    x = logits_nchw.reshape(n, c, hw)
    y = labels_nhw.reshape(n, 1, hw).astype(jnp.int32)
    w_pix = (None if weights is None
             else weights.reshape(n, 1, hw).astype(jnp.float32))

    fuse_mean = (top_k_percent_pixels == 1.0)
    has_weights = w_pix is not None

    tile = _pick_tile(hw, c,
                      has_fused_weights=(fuse_mean and has_weights),
                      per_pixel_out=not fuse_mean,
                      max_tile_lanes=max_tile_lanes)
    num_t = pl.cdiv(hw, tile)
    mask_tail = (hw % tile) != 0

    kern_kw = dict(ignore_label=ignore_label, hw=hw, tile=tile,
                   mask_tail=mask_tail)
    cost = pl.CostEstimate(
        flops=6 * p * c,
        transcendentals=p * (c + 1),
        bytes_accessed=p * c * x.dtype.itemsize + 2 * p * 4)

    if fuse_mean:
        # Fused (optionally weighted) sum path: one scalar per grid cell,
        # global mean over all P pixels in the glue.
        # Split the pixel-tile axis for small batches so both v7x TensorCores
        # get work (neutral on 1-TC v5e/v6e chips).
        if n <= 2 and num_t >= 2 and num_t % 2 == 0:
            outer_t, inner_t = 2, num_t // 2
        else:
            outer_t, inner_t = 1, num_t

        pix_idx = lambda nb, ob, ib: (nb, 0, ob * inner_t + ib)
        in_specs = [pl.BlockSpec((1, 1, tile), pix_idx),      # labels
                    pl.BlockSpec((1, c, tile), pix_idx)]      # logits
        operands = [y, x]
        if has_weights:
            in_specs.append(pl.BlockSpec((1, 1, tile), pix_idx))
            operands.append(w_pix)

        partial = pl.pallas_call(
            functools.partial(_ce_sum_kernel, has_weights=has_weights,
                              inner_t=inner_t, **kern_kw),
            out_shape=jax.ShapeDtypeStruct((n * outer_t, 1, 1), jnp.float32),
            grid_spec=pltpu.PrefetchScalarGridSpec(
                num_scalar_prefetch=0,
                grid=(n, outer_t, inner_t),
                in_specs=in_specs,
                out_specs=pl.BlockSpec(
                    (1, 1, 1), lambda nb, ob, ib: (nb * outer_t + ob, 0, 0)),
                scratch_shapes=[pltpu.VMEM((1, tile), jnp.float32)]),
            compiler_params=pltpu.CompilerParams(
                dimension_semantics=("parallel", "parallel", "arbitrary"),
                vmem_limit_bytes=_VMEM_LIMIT_BYTES),
            cost_estimate=cost,
        )(*operands)
        return jnp.sum(partial) / p

    # Per-pixel path (top-k hard pixel mining): lane-dense (N, 1, HW) slab.
    losses = pl.pallas_call(
        functools.partial(_ce_pixel_kernel, **kern_kw),
        out_shape=jax.ShapeDtypeStruct((n, 1, hw), jnp.float32),
        grid_spec=pltpu.PrefetchScalarGridSpec(
            num_scalar_prefetch=0,
            grid=(n, num_t),
            in_specs=[pl.BlockSpec((1, 1, tile), lambda nb, tb: (nb, 0, tb)),
                      pl.BlockSpec((1, c, tile), lambda nb, tb: (nb, 0, tb))],
            out_specs=pl.BlockSpec((1, 1, tile), lambda nb, tb: (nb, 0, tb))),
        compiler_params=pltpu.CompilerParams(
            dimension_semantics=("parallel", "parallel"),
            vmem_limit_bytes=_VMEM_LIMIT_BYTES),
        cost_estimate=cost,
    )(y, x)

    pixel_losses = losses.reshape(-1)
    if has_weights:
        pixel_losses = pixel_losses * w_pix.reshape(-1)

    # TODO(synk): for DeepLab-scale inputs the sort-based jax.lax.top_k over
    # N*H*W pixels dominates end-to-end; a streaming histogram -> threshold ->
    # fused masked-sum Pallas two-pass would keep this slab out of HBM.
    k = max(1, int(top_k_percent_pixels * p))
    vals, _ = jax.lax.top_k(pixel_losses, k)
    return jnp.mean(vals)


def _reference(logits_nchw, labels_nhw, ignore_label=-1,
               top_k_percent_pixels=1.0, weights=None):
    """Pure-JAX reference mirroring nn.CrossEntropyLoss semantics."""
    n, c, h, w = logits_nchw.shape
    x = jnp.transpose(logits_nchw, (0, 2, 3, 1)).reshape(-1, c)
    x = x.astype(jnp.float32)
    y = labels_nhw.reshape(-1)
    valid = y != ignore_label
    safe_y = jnp.where(valid, y, 0)
    logp = jax.nn.log_softmax(x, axis=-1)
    nll = -jnp.take_along_axis(logp, safe_y[:, None], axis=-1)[:, 0]
    pixel_losses = jnp.where(valid, nll, 0.0)
    if weights is not None:
        pixel_losses = pixel_losses * weights.reshape(-1).astype(jnp.float32)
    if top_k_percent_pixels == 1.0:
        return jnp.mean(pixel_losses)
    k = max(1, int(top_k_percent_pixels * pixel_losses.size))
    vals, _ = jax.lax.top_k(pixel_losses, k)
    return jnp.mean(vals)


if __name__ == "__main__":
    key = jax.random.PRNGKey(0)
    k_logits, k_labels, k_ignore, k_w = jax.random.split(key, 4)

    N, C, H, W = 2, 4, 16, 16
    logits = jax.random.normal(k_logits, (N, C, H, W), dtype=jnp.float32)
    labels = jax.random.randint(k_labels, (N, H, W), 0, C, dtype=jnp.int32)
    ignore_mask = jax.random.uniform(k_ignore, (N, H, W)) < 0.1
    labels = jnp.where(ignore_mask, -1, labels)

    # 1) fused-mean path
    loss = jax.block_until_ready(
        deeplab_ce(logits, labels, ignore_label=-1, top_k_percent_pixels=1.0))
    ref = _reference(logits, labels, -1, 1.0)
    assert jnp.allclose(loss, ref, rtol=1e-5, atol=1e-5), (loss, ref)

    # 2) fused weighted-mean path (weights folded into the sum kernel)
    pix_w = jax.random.uniform(k_w, (N, H, W), minval=0.5, maxval=1.5)
    loss_w = jax.block_until_ready(
        deeplab_ce(logits, labels, ignore_label=-1, weights=pix_w))
    ref_w = _reference(logits, labels, -1, 1.0, weights=pix_w)
    assert jnp.allclose(loss_w, ref_w, rtol=1e-5, atol=1e-5), (loss_w, ref_w)

    # 3) hard-pixel-mining (top-k) path
    loss_topk = jax.block_until_ready(
        deeplab_ce(logits, labels, ignore_label=-1, top_k_percent_pixels=0.25))
    ref_topk = _reference(logits, labels, -1, 0.25)
    assert jnp.allclose(loss_topk, ref_topk, rtol=1e-5, atol=1e-5), (loss_topk,
                                                                     ref_topk)

    # 4) multi-tile + ragged tail + pixel-axis megacore split
    #    (HW=144, tile forced to 128 -> 2 tiles -> grid (N, 2, 1))
    H2 = W2 = 12
    logits2 = jax.random.normal(k_logits, (N, C, H2, W2), dtype=jnp.float32)
    labels2 = jax.random.randint(k_labels, (N, H2, W2), 0, C, dtype=jnp.int32)
    ignore_mask2 = jax.random.uniform(k_ignore, (N, H2, W2)) < 0.1
    labels2 = jnp.where(ignore_mask2, -1, labels2)
    loss2 = jax.block_until_ready(
        deeplab_ce(logits2, labels2, ignore_label=-1,
                   top_k_percent_pixels=1.0, max_tile_lanes=128))
    ref2 = _reference(logits2, labels2, -1, 1.0)
    assert jnp.allclose(loss2, ref2, rtol=1e-5, atol=1e-5), (loss2, ref2)

    # 5) multi-tile + ragged tail on the per-pixel (top-k) path
    loss2_topk = jax.block_until_ready(
        deeplab_ce(logits2, labels2, ignore_label=-1,
                   top_k_percent_pixels=0.5, max_tile_lanes=128))
    ref2_topk = _reference(logits2, labels2, -1, 0.5)
    assert jnp.allclose(loss2_topk, ref2_topk, rtol=1e-5, atol=1e-5), (
        loss2_topk, ref2_topk)

    print("KERNEL_OK")
</pallas_src>

<mosaic_0001>
module attributes {stable_mosaic.version = 11 : i64} {
  func.func @_ce_sum_kernel(%arg0: i32, %arg1: i32, %arg2: i32, %arg3: memref<1x1x256xi32, #tpu.memory_space<vmem>>, %arg4: memref<1x4x256xf32, #tpu.memory_space<vmem>>, %arg5: memref<1x1x1xf32, #tpu.memory_space<vmem>>, %arg6: memref<1x256xf32, #tpu.memory_space<vmem>>) attributes {dimension_semantics = [#tpu.dimension_semantics<parallel>, #tpu.dimension_semantics<parallel>, #tpu.dimension_semantics<arbitrary>], iteration_bounds = array<i64: 2, 1, 1>, scalar_prefetch = 0 : i64, scratch_operands = 1 : i64, tpu.core_type = #tpu.core_type<tc>, window_params = [{transform_indices = @transform_0, window_bounds = array<i64: 1, 1, 256>}, {transform_indices = @transform_1, window_bounds = array<i64: 1, 4, 256>}, {transform_indices = @transform_2, window_bounds = array<i64: 1, 1, 1>}]} {
    %c0_i32 = arith.constant 0 : i32
    %0 = arith.cmpi eq, %arg2, %c0_i32 : i32
    %1 = arith.extui %0 : i1 to i32
    %c0_i32_0 = arith.constant 0 : i32
    %2 = arith.cmpi ne, %1, %c0_i32_0 : i32
    scf.if %2 {
      %cst_17 = arith.constant 0.000000e+00 : f32
      %37 = vector.broadcast %cst_17 : f32 to vector<1x256xf32>
      %c0_18 = arith.constant 0 : index
      %c0_19 = arith.constant 0 : index
      %38 = vector.load %arg6[%c0_18, %c0_19] : memref<1x256xf32, #tpu.memory_space<vmem>>, vector<1x256xf32>
      tpu.vector_store %arg6[%c0_18, %c0_19], %37 {strides = array<i32>} : memref<1x256xf32, #tpu.memory_space<vmem>>, vector<1x256xf32>,
    } else {
    }
    %c0 = arith.constant 0 : index
    %c0_1 = arith.constant 0 : index
    %3 = vector.load %arg6[%c0, %c0_1] : memref<1x256xf32, #tpu.memory_space<vmem>>, vector<1x256xf32>
    %c0_2 = arith.constant 0 : index
    %c0_3 = arith.constant 0 : index
    %c0_4 = arith.constant 0 : index
    %4 = vector.load %arg4[%c0_2, %c0_3, %c0_4] : memref<1x4x256xf32, #tpu.memory_space<vmem>>, vector<1x4x256xf32>
    %5 = vector.shape_cast %4 : vector<1x4x256xf32> to vector<4x256xf32>
    %c0_5 = arith.constant 0 : index
    %c0_6 = arith.constant 0 : index
    %c0_7 = arith.constant 0 : index
    %6 = vector.load %arg3[%c0_5, %c0_6, %c0_7] : memref<1x1x256xi32, #tpu.memory_space<vmem>>, vector<1x1x256xi32>
    %7 = vector.shape_cast %6 : vector<1x1x256xi32> to vector<1x256xi32>
    %cst = arith.constant dense<0xFF800000> : vector<256xf32>
    %8 = vector.multi_reduction <maximumf>, %5, %cst [0] : vector<4x256xf32> to vector<256xf32>
    %9 = vector.shape_cast %8 : vector<256xf32> to vector<1x256xf32>
    %10 = vector.broadcast %9 : vector<1x256xf32> to vector<4x256xf32>
    %11 = arith.subf %5, %10 : vector<4x256xf32>
    %12 = math.exp %11 : vector<4x256xf32>
    %cst_8 = arith.constant dense<0.000000e+00> : vector<256xf32>
    %13 = vector.multi_reduction <add>, %12, %cst_8 [0] : vector<4x256xf32> to vector<256xf32>
    %14 = vector.shape_cast %13 : vector<256xf32> to vector<1x256xf32>
    %15 = math.log %14 : vector<1x256xf32>
    %16 = arith.addf %9, %15 : vector<1x256xf32>
    %c-1_i32 = arith.constant -1 : i32
    %17 = vector.broadcast %c-1_i32 : i32 to vector<1x256xi32>
    %18 = arith.cmpi ne, %7, %17 : vector<1x256xi32>
    %c0_i32_9 = arith.constant 0 : i32
    %19 = vector.broadcast %c0_i32_9 : i32 to vector<1x256xi32>
    %20 = arith.select %18, %7, %19 : vector<1x256xi1>, vector<1x256xi32>
    %21 = tpu.iota {dimensions = array<i32: 0>} : vector<4x1xi32>
    %22 = vector.broadcast %21 : vector<4x1xi32> to vector<4x256xi32>
    %23 = vector.broadcast %20 : vector<1x256xi32> to vector<4x256xi32>
    %24 = arith.cmpi eq, %22, %23 : vector<4x256xi32>
    %cst_10 = arith.constant 0.000000e+00 : f32
    %25 = vector.broadcast %cst_10 : f32 to vector<4x256xf32>
    %26 = arith.select %24, %5, %25 : vector<4x256xi1>, vector<4x256xf32>
    %cst_11 = arith.constant dense<0.000000e+00> : vector<256xf32>
    %27 = vector.multi_reduction <add>, %26, %cst_11 [0] : vector<4x256xf32> to vector<256xf32>
    %28 = vector.shape_cast %27 : vector<256xf32> to vector<1x256xf32>
    %29 = arith.subf %16, %28 : vector<1x256xf32>
    %cst_12 = arith.constant 0.000000e+00 : f32
    %30 = vector.broadcast %cst_12 : f32 to vector<1x256xf32>
    %31 = arith.select %18, %29, %30 : vector<1x256xi1>, vector<1x256xf32>
    %32 = arith.addf %3, %31 : vector<1x256xf32>
    %c0_13 = arith.constant 0 : index
    %c0_14 = arith.constant 0 : index
    %33 = vector.load %arg6[%c0_13, %c0_14] : memref<1x256xf32, #tpu.memory_space<vmem>>, vector<1x256xf32>
    tpu.vector_store %arg6[%c0_13, %c0_14], %32 {strides = array<i32>} : memref<1x256xf32, #tpu.memory_space<vmem>>, vector<1x256xf32>,
    %c0_i32_15 = arith.constant 0 : i32
    %34 = arith.cmpi eq, %arg2, %c0_i32_15 : i32
    %35 = arith.extui %34 : i1 to i32
    %c0_i32_16 = arith.constant 0 : i32
    %36 = arith.cmpi ne, %35, %c0_i32_16 : i32
    scf.if %36 {
      %c0_17 = arith.constant 0 : index
      %c0_18 = arith.constant 0 : index
      %37 = vector.load %arg6[%c0_17, %c0_18] : memref<1x256xf32, #tpu.memory_space<vmem>>, vector<1x256xf32>
      %cst_19 = arith.constant dense<0.000000e+00> : vector<1xf32>
      %38 = vector.multi_reduction <add>, %37, %cst_19 [1] : vector<1x256xf32> to vector<1xf32>
      %39 = vector.shape_cast %38 : vector<1xf32> to vector<1x1xf32>
      %40 = vector.shape_cast %39 : vector<1x1xf32> to vector<1x1x1xf32>
      %c0_20 = arith.constant 0 : index
      %c0_21 = arith.constant 0 : index
      %c0_22 = arith.constant 0 : index
      %41 = vector.load %arg5[%c0_20, %c0_21, %c0_22] : memref<1x1x1xf32, #tpu.memory_space<vmem>>, vector<1x1x1xf32>
      tpu.vector_store %arg5[%c0_20, %c0_21, %c0_22], %40 {strides = array<i32>} : memref<1x1x1xf32, #tpu.memory_space<vmem>>, vector<1x1x1xf32>,
    } else {
    }
    return
  }
  func.func @transform_0(%arg0: i32, %arg1: i32, %arg2: i32) -> (i32, i32, i32) {
    %c1_i32 = arith.constant 1 : i32
    %0 = arith.muli %arg1, %c1_i32 : i32
    %1 = arith.addi %0, %arg2 : i32
    %c0_i32 = arith.constant 0 : i32
    %c0_i32_0 = arith.constant 0 : i32
    return %arg0, %c0_i32, %1 : i32, i32, i32
  }
  func.func @transform_1(%arg0: i32, %arg1: i32, %arg2: i32) -> (i32, i32, i32) {
    %c1_i32 = arith.constant 1 : i32
    %0 = arith.muli %arg1, %c1_i32 : i32
    %1 = arith.addi %0, %arg2 : i32
    %c0_i32 = arith.constant 0 : i32
    %c0_i32_0 = arith.constant 0 : i32
    return %arg0, %c0_i32, %1 : i32, i32, i32
  }
  func.func @transform_2(%arg0: i32, %arg1: i32, %arg2: i32) -> (i32, i32, i32) {
    %c1_i32 = arith.constant 1 : i32
    %0 = arith.muli %arg0, %c1_i32 : i32
    %1 = arith.addi %0, %arg1 : i32
    %c0_i32 = arith.constant 0 : i32
    %c0_i32_0 = arith.constant 0 : i32
    %c0_i32_1 = arith.constant 0 : i32
    return %1, %c0_i32, %c0_i32_0 : i32, i32, i32
  }
}

</mosaic_0001>

<bundles_post_ra>
// kernel: tpu_custom_call.1
= control target key start
LH: loop header
LB: loop body
LE: loop exit
PB: predicated region body
PF: predicated region fallthrough
CT: control target
= control target key end

     0   :  { %7 = vsyncpa [#allocation4], 0  ;;  %s809_s0 = inlined_call_operand.hbm [shape: s32[2,1,256], index: 0, kind: input, shape index: {}]   ;;  %s810_s1 = inlined_call_operand.hbm [shape: f32[2,4,256], index: 1, kind: input, shape index: {}]   ;;  %s811_s2 = inlined_call_operand.vmem [shape: f32[2,1,1], index: 2, kind: output, shape index: {}]  }
   0x1   :  { %9 = vsyncpa [#allocation4 + $0x1], 0 }
   0x2   :  { %10 = vsyncpa [#allocation6], 0 }
   0x3   :  { %12 = vsyncpa [#allocation6 + $0x1], 0  ;;  %s685_s9 = smov 0   ;;  %s687_s10 = smov 0  }
   0x4   :  { %s689_s11 = smov 0   ;;  %s691_s12 = smov 0  }
   0x5   :  { %s693_s13 = smov 0   ;;  %s695_s14 = smov 0  }
   0x6 LB: > { %s471_s15 = sadd.s32 4294967295, %s667_s14   ;;  %s37_s16 = sadd.s32 1, %s663_s13  ;;  %s667_s14 = sphi %s695_s14, %s18_s14   ;;  %s663_s13 = sphi %s693_s13, %s821_s13   ;;  %s659_s12 = sphi %s691_s12, %s820_s12   ;;  %s655_s11 = sphi %s689_s11, %s819_s11   ;;  %s651_s10 = sphi %s687_s10, %s818_s10   ;;  %s647_s9 = sphi %s685_s9, %s817_s9  }
   0x7   : > { %p39_p0 = scmp.ge.s32.totalorder %s37_s16, 2  ;;  %s48_s17 = sadd.s32 1, %s655_s11 }
   0x8   : > { %p55_p1 = scmp.ne.s32.totalorder %s655_s11, %s651_s10  ;;  %p56_p2 = scmp.eq.s32.totalorder %s667_s14, 0 }
   0x9   : > { %s823_s16 = smov (%p39_p0, %s37_s16), 0  ;;  %p61_p4 = scmp.ne.s32.totalorder %s651_s10, %s647_s9 }
   0xa   : > { %p721_p3 = por %p56_p2, %p55_p1  ;;  %s43_s19 = ssub.s32 %s663_s13, %s823_s16 }
   0xb   : > { %p62_p5 = scmp.eq.s32.totalorder %s471_s15, 0  ;;  %p46_p6 = scmp.eq.s32.totalorder %s43_s19, 0 }
   0xc   : > { %p497_p8 = scmp.lt.s32.totalorder %s667_s14, 2  ;;  %s143_s22 = sand.u32 1, %s655_s11  }
   0xd   : > { %p728_p7 = por %p62_p5, %p61_p4  ;;  %s476_s23 = sshll.u32 %s663_s13, 1 }
   0xe   : > { %s734_s21 = scalar_select %p46_p6, %s655_s11, %s48_s17  }
   0xf   : > { %s475_s24 = sshll.u32 %s143_s22, 1  ;;  %s154_s27 = scalar_lea.hbm %s809_s0, %s476_s23 }
  0x10   : > { %s156_s28 = sshll.u32 %s154_s27, 4  ;;  %s147_s29 = scalar_lea.vmem [#allocation3], %s475_s24  ;;  %s157_s28 = int_to_ptr.hbm [resolvable:$true] %s156_s28 }
  0x11   : > { %s158_s30 = sshll.u32 %s147_s29, 4  ;;  %p743_p9 = pnand %p497_p8, %p721_p3  ;;  %s159_s30 = int_to_ptr.vmem [resolvable:$true] %s158_s30 }
  0x12   : > { %p480_p10 = scmp.ge.s32.totalorder %s667_s14, 1  ;;  %p186_p11 = scmp.lt.s32.totalorder %s667_s14, 3 }
  0x13   : > { %s477_s4 = sshll.u32 %s143_s22, 3  ;;  %s144_s5 = scalar_lea.sflag [#allocation4], %s143_s22 }
  0x14   : > { %493 = dma.hbm_to_vmem [thread:$0]  (!%p743_p9), %s157_s28, 32, %s159_s30, %s144_s5  }
  0x15   : > { %p187_p12 = pnand %p480_p10, %p186_p11  ;;  %s485_s6 = sshll.u32 %s663_s13, 3 }
  0x16   : > { %s169_s7 = scalar_lea.vmem [#allocation5], %s477_s4  ;;  %s177_s17 = scalar_lea.hbm %s810_s1, %s485_s6 }
  0x17   : > { %s181_s8 = sshll.u32 %s169_s7, 4  ;;  %s179_s18 = sshll.u32 %s177_s17, 4  ;;  %s182_s8 = int_to_ptr.vmem [resolvable:$true] %s181_s8  ;;  %s180_s18 = int_to_ptr.hbm [resolvable:$true] %s179_s18 }
  0x18   : > { %s166_s19 = scalar_lea.sflag [#allocation6], %s143_s22  ;;  %190 = sbr.rel (%p187_p12) target bundleno = 240 (0xf0), region = 28 }
  0x19   : > { %496 = dma.hbm_to_vmem [thread:$0]  (!%p743_p9), %s180_s18, 128, %s182_s8, %s166_s19  }
  0x1a   : > { %s192_s23 = sand.u32 (!%p187_p12), 1, %s651_s10  }
  0x1b   : > { %s481_s24 = sshll.u32 (!%p187_p12), %s192_s23, 1  ;;  %s193_s25 = scalar_lea.sflag (!%p187_p12), [#allocation4], %s192_s23 }
  0x1c   : > { %s758_s26 = scalar_lea.vmem (!%p187_p12), [#allocation3], %s481_s24 }
  0x1d   : > { %638 = dma.done.wait (%p728_p7), %s193_s25, 32  }
  0x1e   : > { %640 = vsyncadd (%p728_p7), %s193_s25, 4294967264  ;;  %s482_s27 = sshll.u32 %s192_s23, 3  ;;  %s203_s28 = scalar_lea.sflag [#allocation6], %s192_s23 }
  0x1f   : > { %s206_s29 = scalar_lea.vmem [#allocation5], %s482_s27 }
  0x20   : > { %642 = dma.done.wait (%p728_p7), %s203_s28, 128  }
  0x21   : > { %644 = vsyncadd (%p728_p7), %s203_s28, 4294967168  ;;  %v245_v0 = vlaneseq  ;;  %v669_v2 = vmov 0.0   ;;  %v251_v3 = vld [vmem:[%s206_s29] sm:$0xff]  ;;  %vm259_vm1 = vcmask 1043456   ;;  %v252_v25 = vld [vmem:[%s758_s26] sm:$0x3] }
  0x22   : > { %254 = vst [vmem:[#allocation1] ss:$2 sm:$0xff] %v251_v3  ;;  %vm308_vm2 = vcmp.ne.s32.totalorder %v252_v25, 4294967295  ;;  %vm342_vm5 = vcmask 1040384   ;;  %p237_p13 = scmp.lt.s32.totalorder %s659_s12, 1  ;;  %vm366_vm6 = vcmask 0  }
  0x23   : > { %vm768_vm0 = vcmp.lt.s32.totalorder %v245_v0, 256  ;;  %v309_v26 = vsel %vm308_vm2, %v252_v25, 0  ;;  %v311_v31 = vshrl.u32 %v245_v0, 7 }
  0x24   : > { %249 = vst.msk [vmem:[#allocation2] sm:$0x3] %vm768_vm0, %v669_v2  ;;  %v312_v34 = vperm.slane %v309_v26, 0  ;;  %v313_v35 = vperm.slane %v309_v26, 1  ;;  %s825_s12 = smov (!%p237_p13, %s659_s12), 1 }
  0x25   : > { %s239_s30 = scalar_lea.vmem %s811_s2, %s825_s12 }
  0x26   : > { %vm314_vm3 = vcmp.eq.s32.totalorder %v311_v31, %v312_v34  ;;  %vm315_vm4 = vcmp.eq.s32.totalorder %v311_v31, %v313_v35 }
  0x29   : > { %v255_v4 = vld.sshfl [vmem:[#allocation1] sm:$0xff pattern:$0x75316420]  ;;  %v256_v5 = vld.sshfl [vmem:[#allocation1 + $0x8] sm:$0xff pattern:$0x75316420] }
  0x2a   : > { %v260_v6 = vsel %vm259_vm1, %v255_v4, -inf  ;;  %v267_v7 = vsel %vm259_vm1, %v256_v5, -inf }
  0x2b   : > { %v261_v8 = vrot.slane %v260_v6, 4  ;;  %v268_v9 = vrot.slane %v267_v7, 4 }
  0x2d   : > { %v262_v10 = vmax.f32 %v260_v6, %v261_v8  ;;  %v269_v11 = vmax.f32 %v267_v7, %v268_v9 }
  0x2f   : > { %v263_v12 = vrot.slane %v262_v10, 2  ;;  %v270_v13 = vrot.slane %v269_v11, 2 }
  0x31   : > { %v264_v14 = vmax.f32 %v262_v10, %v263_v12  ;;  %v271_v15 = vmax.f32 %v269_v11, %v270_v13  ;;  %v250_v10 = vld [vmem:[#allocation2] sm:$0x3] }
  0x33   : > { %v265_v16 = vrot.slane %v264_v14, 1  ;;  %v272_v17 = vrot.slane %v271_v15, 1 }
  0x35   : > { %v266_v18 = vmax.f32 %v264_v14, %v265_v16  ;;  %v273_v19 = vmax.f32 %v271_v15, %v272_v17 }
  0x37   : > { %v276_v20 = vrot.slane %v273_v19, 4 }
  0x39   : > { %v277_v21 = vsel %vm259_vm1, %v266_v18, %v276_v20 }
  0x3a   : > { %v279_v22 = vsub.f32 %v251_v3, %v277_v21 }
  0x3c   : > { %v280_v23 = vmul.f32 1.442695, %v279_v22 }
  0x3e   : > { %547 = vpow2.f32 %v280_v23 }
  0x44   : > { %v548_v24 = vpop.eup %547 }
  0x45   : > { %283 = vst [vmem:[#allocation1] ss:$2 sm:$0xff] %v548_v24 }
  0x4c   : > { %v284_v27 = vld.sshfl [vmem:[#allocation1] sm:$0xff pattern:$0x75316420]  ;;  %v285_v28 = vld.sshfl [vmem:[#allocation1 + $0x8] sm:$0xff pattern:$0x75316420] }
  0x4d   : > { %v288_v29 = vsel %vm259_vm1, %v284_v27, 0.0  ;;  %v295_v30 = vsel %vm259_vm1, %v285_v28, 0.0  ;;  %316 = vst [vmem:[#allocation1] ss:$2 sm:$0xff] %v251_v3 }
  0x4e   : > { %v289_v32 = vrot.slane %v288_v29, 4  ;;  %v296_v33 = vrot.slane %v295_v30, 4 }
  0x50   : > { %v290_v36 = vadd.f32 %v289_v32, %v288_v29  ;;  %v297_v37 = vadd.f32 %v296_v33, %v295_v30 }
  0x52   : > { %v291_v38 = vrot.slane %v290_v36, 2  ;;  %v298_v39 = vrot.slane %v297_v37, 2 }
  0x54   : > { %v292_v40 = vadd.f32 %v291_v38, %v290_v36  ;;  %v299_v41 = vadd.f32 %v298_v39, %v297_v37  ;;  %v317_v42 = vld.sshfl [vmem:[#allocation1] sm:$0xff pattern:$0x75316420]  ;;  %v318_v43 = vld.sshfl [vmem:[#allocation1 + $0x8] sm:$0xff pattern:$0x75316420] }
  0x55   : > { %v321_v44 = vsel %vm314_vm3, %v317_v42, 0.0  ;;  %v322_v45 = vsel %vm315_vm4, %v318_v43, 0.0 }
  0x56   : > { %v293_v46 = vrot.slane %v292_v40, 1  ;;  %v300_v47 = vrot.slane %v299_v41, 1  ;;  %v323_v48 = vsel %vm259_vm1, %v321_v44, 0.0  ;;  %v330_v49 = vsel %vm259_vm1, %v322_v45, 0.0 }
  0x57   : > { %v324_v50 = vrot.slane %v323_v48, 4  ;;  %v331_v51 = vrot.slane %v330_v49, 4 }
  0x58   : > { %v294_v52 = vadd.f32 %v293_v46, %v292_v40  ;;  %v301_v53 = vadd.f32 %v300_v47, %v299_v41 }
  0x59   : > { %v325_v54 = vadd.f32 %v324_v50, %v323_v48  ;;  %v332_v55 = vadd.f32 %v331_v51, %v330_v49 }
  0x5a   : > { %549 = vlog2.f32 %v294_v52 }
  0x5b   : > { %551 = vlog2.f32 %v301_v53  ;;  %v326_v56 = vrot.slane %v325_v54, 2  ;;  %v333_v57 = vrot.slane %v332_v55, 2 }
  0x5d   : > { %v327_v58 = vadd.f32 %v326_v56, %v325_v54  ;;  %v334_v59 = vadd.f32 %v333_v57, %v332_v55 }
  0x5f   : > { %v328_v60 = vrot.slane %v327_v58, 1  ;;  %v335_v61 = vrot.slane %v334_v59, 1 }
  0x60   : > { %v550_v62 = vpop.eup %549 }
  0x61   : > { %v552_v63 = vpop.eup %551  ;;  %v303_v0 = vmul.f32 0.6931472, %v550_v62  ;;  %v329_v3 = vadd.f32 %v328_v60, %v327_v58  ;;  %v336_v4 = vadd.f32 %v335_v61, %v334_v59 }
  0x62   : > { %v305_v2 = vmul.f32 0.6931472, %v552_v63 }
  0x63   : > { %v306_v5 = vadd.f32 %v303_v0, %v266_v18 }
  0x64   : > { %v307_v6 = vadd.f32 %v305_v2, %v273_v19 }
  0x65   : > { %v337_v7 = vsub.f32 %v306_v5, %v329_v3 }
  0x66   : > { %v338_v8 = vsub.f32 %v307_v6, %v336_v4 }
  0x68   : > { %v341_v9 = vrot.slane %v338_v8, 7 }
  0x6a   : > { %v343_v11 = vsel %vm342_vm5, %v337_v7, %v341_v9 }
  0x6b   : > { %v345_v12 = vsel %vm308_vm2, %v343_v11, 0.0 }
  0x6c   : > { %v346_v13 = vadd.f32 %v345_v12, %v250_v10 }
  0x6e   : > { %351 = vst.msk [vmem:[#allocation2] sm:$0x3] %vm768_vm0, %v346_v13 }
  0x75   : > { %v355_v14 = vld [vmem:[#allocation2] sm:$0x3] }
  0x76   : > { %v357_v15 = vperm.slane %v355_v14, 0  ;;  %v358_v16 = vperm.slane %v355_v14, 1 }
  0x78   : > { %v361_v17 = vsel %vm342_vm5, %v357_v15, 0.0  ;;  %v362_v18 = vsel %vm342_vm5, %v358_v16, 0.0 }
  0x79   : > { %v363_v19 = vadd.f32 %v362_v18, %v361_v17 }
  0x7b   : > { %364 = vadd.xlane.f32.xlu0 %v363_v19 }
  0xee   : > { %v365_v20 = vpop.xlane.xlu0 %364 }
  0xef   : > { %367 = vst.msk [vmem:[%s239_s30] sm:$0x1] %vm366_vm6, %v365_v20 }
  0xf0 PF: > { %s18_s14 = sadd.s32 1, %s667_s14   ;;  %s817_s9 = smov %s651_s10 }
  0xf1   : > { %p15_p0 = scmp.ge.s32.totalorder %s18_s14, 4   ;;  %s818_s10 = smov %s655_s11 }
  0xf2   : > { %s819_s11 = smov %s734_s21  ;;  %s820_s12 = smov %s663_s13 }
  0xf3   : > { %s821_s13 = smov %s823_s16  ;;  %17 = sbr.rel (!%p15_p0) target bundleno = 6 (0x6), region = 89 }
  0xf8   :  { %388 = vsyncpa [#allocation4], 1 }
  0xf9   :  { %390 = vsyncpa [#allocation4 + $0x1], 1 }
  0xfa   :  { %391 = vsyncpa [#allocation6], 1 }
  0xfb   :  { %393 = vsyncpa [#allocation6 + $0x1], 1 }

</bundles_post_ra>
